<compile_context>
chip_gen: v7x
topology: tpu7x:2x2x1
jax: 0.10.0
libtpu: 0.0.40
codegen_flags: <defaults>
</compile_context>

<pallas_src>
import jax
import jax.numpy as jnp
from jax.experimental import pallas as pl
from jax.experimental.pallas import tpu as pltpu


def round_up(x, m):
    return ((x + m - 1) // m) * m


def _vmem_limit_bytes():
    # ~3/4 of physical VMEM (48 MiB on v7x's 64 MiB/TC, 96 MiB on v5e/v6e's 128 MiB), cap 100 MiB.
    try:
        cap = int(pltpu.get_tpu_info().vmem_capacity_bytes)
    except Exception:
        cap = 64 * 1024 * 1024
    return min(cap * 3 // 4, 100 * 1024 * 1024)


# --------------------------------------------------------------------------- kernel 1
def _deconv_gemm_kernel(w_ref, x_ref, y_ref, sum_ref, ssq_ref):
    # w_ref : (4*Cout_p, 9*Cin_p) bf16  phase-folded, tap-zero-padded weights (VMEM resident)
    # x_ref : (9*Cin_p, bn)       bf16  9 shifted copies of x, flattened (B*H*W) pixel block
    # y_ref : (4*Cout_p, bn)      bf16  conv output, rows = phase*Cout_p + cout
    # sum_ref / ssq_ref : (1, 4, Cout_p) f32  per-block BN partials (Cout_p on lanes)
    acc = jnp.dot(w_ref[...], x_ref[...], preferred_element_type=jnp.float32)
    y_ref[...] = acc.astype(y_ref.dtype)
    acc4 = acc.reshape(4, -1, acc.shape[-1])            # free major split: (4, Cout_p, bn)
    sum_ref[...] = jnp.sum(acc4, axis=2)[None]
    ssq_ref[...] = jnp.sum(acc4 * acc4, axis=2)[None]


# --------------------------------------------------------------------------- kernel 2
def _bn_lrelu_kernel(y_ref, scale_ref, shift_ref, o_ref):
    z = y_ref[...].astype(jnp.float32) * scale_ref[...] + shift_ref[...]
    o_ref[...] = jnp.maximum(z, 0.1 * z).astype(o_ref.dtype)      # LeakyReLU(0.1)


# --------------------------------------------------------------------------- wrapper
@jax.jit
def deconv4x4_forward(x, w, gamma, beta, skip):
    """x: (B, Cin, H, W); w: (Cin, Cout, 4, 4) (PyTorch ConvTranspose2d layout);
       gamma, beta: (Cout,); skip: (B, Cskip, 2H, 2W) -> (B, Cout + Cskip, 2H, 2W)."""
    B, Cin, H, W = x.shape
    Cout = w.shape[1]
    Cin_p = round_up(Cin, 16)            # bf16 sublane packing
    Cout_p = round_up(Cout, 16)
    Npix = B * H * W
    K = 9 * Cin_p                        # 9 shifted taps folded into the contraction
    M = 4 * Cout_p                       # 4 sub-pixel phases folded into the output rows

    vmem_limit = _vmem_limit_bytes()
    blk_budget = vmem_limit // 2

    def _blk_bytes(b):
        return (M * K * 2                # resident folded weight (bf16)
                + 2 * K * b * 2          # double-buffered x block (bf16)
                + 2 * M * b * 2          # double-buffered y block (bf16)
                + 4 * M * 4              # double-buffered stats blocks (f32)
                + (1 << 20))             # Mosaic internal scratch margin

    # N-tile: large & lane-dense, clamped to the VMEM budget; force >=2 blocks so both
    # v7x TensorCores get work on the "parallel" axis.
    bn = min(4096, round_up(Npix, 128))
    while bn > 256 and _blk_bytes(bn) > blk_budget:
        bn = max(256, round_up(bn // 2, 128))
    if Npix > 256 and pl.cdiv(Npix, bn) < 2:
        bn = max(128, round_up(pl.cdiv(Npix, 2), 128))
    Npix_p = round_up(Npix, bn)
    n_blk = Npix_p // bn

    # ---- glue: bf16 3x3 shifted stack of the input, built directly in (9, Cin_p, Npix) ----
    x_t = jnp.transpose(x, (1, 0, 2, 3)).astype(jnp.bfloat16)          # (Cin, B, H, W)
    x_t = jnp.pad(x_t, ((0, Cin_p - Cin), (0, 0), (1, 1), (1, 1)))     # (Cin_p, B, H+2, W+2)
    x9 = jnp.stack([x_t[:, :, dr:dr + H, dc:dc + W].reshape(Cin_p, Npix)
                    for dr in range(3) for dc in range(3)], axis=0)    # (9, Cin_p, Npix)
    x9 = jnp.pad(x9, ((0, 0), (0, 0), (0, Npix_p - Npix)))
    x9 = x9.reshape(K, Npix_p)                                         # free leading merge

    # ---- glue: phase- and tap-folded weight (4*Cout_p, 9*Cin_p), zero-padded taps ----
    # output pixel (2i+r, 2j+s) = sum_{dr,dc in {0,1}} x[i+r+dr-1, j+s+dc-1] * w[:,:,3-r-2dr,3-s-2dc]
    row_blocks = []
    for r in range(2):
        for s in range(2):
            col_blocks = []
            for m in range(9):
                mr, mc = divmod(m, 3)
                dr, dc = mr - r, mc - s
                if dr in (0, 1) and dc in (0, 1):
                    wt = jnp.transpose(w[:, :, 3 - r - 2 * dr, 3 - s - 2 * dc])  # (Cout, Cin)
                    col_blocks.append(jnp.pad(wt, ((0, Cout_p - Cout), (0, Cin_p - Cin))))
                else:
                    col_blocks.append(jnp.zeros((Cout_p, Cin_p), w.dtype))
            row_blocks.append(jnp.concatenate(col_blocks, axis=1))
    w_big = jnp.concatenate(row_blocks, axis=0).astype(jnp.bfloat16)   # (M, K)

    cp = pltpu.CompilerParams(dimension_semantics=("parallel",),
                              vmem_limit_bytes=vmem_limit)

    # ---- pass 1: one wide MXU matmul per pixel block + fused BN partial sums ----
    y_conv, sums, ssqs = pl.pallas_call(
        _deconv_gemm_kernel,
        out_shape=(jax.ShapeDtypeStruct((M, Npix_p), jnp.bfloat16),
                   jax.ShapeDtypeStruct((n_blk, 4, Cout_p), jnp.float32),
                   jax.ShapeDtypeStruct((n_blk, 4, Cout_p), jnp.float32)),
        grid=(n_blk,),
        in_specs=[pl.BlockSpec((M, K), lambda j: (0, 0)),
                  pl.BlockSpec((K, bn), lambda j: (0, j))],
        out_specs=(pl.BlockSpec((M, bn), lambda j: (0, j)),
                   pl.BlockSpec((1, 4, Cout_p), lambda j: (j, 0, 0)),
                   pl.BlockSpec((1, 4, Cout_p), lambda j: (j, 0, 0))),
        compiler_params=cp,
    )(w_big, x9)

    # ---- tiny JAX reduction: Chan-style combine of per-block partials -> BN scale/shift ----
    last_cnt = Npix - (n_blk - 1) * bn                    # real (unpadded) pixels in last block
    cnt = jnp.full((n_blk,), float(bn), jnp.float32).at[-1].set(float(last_cnt))
    cnt3 = cnt[:, None, None]
    mean_blk = sums / cnt3
    m2_blk = ssqs - sums * mean_blk
    total_cnt = jnp.float32(4 * Npix)                     # = B * 2H * 2W per channel
    mean_c = jnp.sum(sums, axis=(0, 1)) / total_cnt       # (Cout_p,)
    m2_c = jnp.sum(m2_blk + cnt3 * jnp.square(mean_blk - mean_c[None, None, :]), axis=(0, 1))
    var_c = jnp.maximum(m2_c / total_cnt, 0.0)            # biased var, as in torch BN training
    inv = jax.lax.rsqrt(var_c + 1e-5)
    gamma_p = jnp.pad(gamma.astype(jnp.float32), (0, Cout_p - Cout))
    beta_p = jnp.pad(beta.astype(jnp.float32), (0, Cout_p - Cout))
    scale_c = gamma_p * inv
    shift_c = beta_p - mean_c * scale_c
    scale = jnp.tile(scale_c, 4).reshape(M, 1)            # per-row (phase-major) scale/shift
    shift = jnp.tile(shift_c, 4).reshape(M, 1)

    # ---- pass 2: normalize + LeakyReLU, in place over the bf16 conv output ----
    y_act = pl.pallas_call(
        _bn_lrelu_kernel,
        out_shape=jax.ShapeDtypeStruct((M, Npix_p), jnp.bfloat16),
        grid=(n_blk,),
        in_specs=[pl.BlockSpec((M, bn), lambda j: (0, j)),
                  pl.BlockSpec((M, 1), lambda j: (0, 0)),
                  pl.BlockSpec((M, 1), lambda j: (0, 0))],
        out_specs=pl.BlockSpec((M, bn), lambda j: (0, j)),
        input_output_aliases={0: 0},
        compiler_params=cp,
    )(y_conv, scale, shift)

    # ---- glue: interleave the 4 phases into the (2H, 2W) map and concat the skip ----
    y = y_act.reshape(4, Cout_p, Npix_p)[:, :Cout, :Npix].reshape(2, 2, Cout, B, H, W)
    y = jnp.transpose(y, (3, 2, 4, 0, 5, 1)).reshape(B, Cout, 2 * H, 2 * W)
    return jnp.concatenate([y.astype(skip.dtype), skip], axis=1)


# --------------------------------------------------------------------------- main
if __name__ == "__main__":
    key = jax.random.PRNGKey(0)
    kx, kw, kg, kb, ks = jax.random.split(key, 5)

    B, Cin, Cout, H, W = 2, 16, 8, 16, 16
    Cskip = 8

    x = jax.random.normal(kx, (B, Cin, H, W), jnp.float32)
    # PyTorch ConvTranspose2d weight layout: (in_channels, out_channels, kH, kW)
    w = jax.random.normal(kw, (Cin, Cout, 4, 4), jnp.float32) * (1.0 / (Cin * 16) ** 0.5)
    gamma = 1.0 + 0.1 * jax.random.normal(kg, (Cout,), jnp.float32)   # BN affine weight
    beta = 0.1 * jax.random.normal(kb, (Cout,), jnp.float32)          # BN affine bias
    skip = jax.random.normal(ks, (B, Cskip, 2 * H, 2 * W), jnp.float32)

    out = deconv4x4_forward(x, w, gamma, beta, skip)
    out = jax.block_until_ready(out)

    # pure-JAX reference: transposed conv = conv(dilated x, flipped W^T), BN (batch stats),
    # LeakyReLU(0.1), concat.  Same bf16 operand precision as the kernel, f32 accumulation.
    w_conv = jnp.transpose(w, (1, 0, 2, 3))[:, :, ::-1, ::-1]
    y_ref = jax.lax.conv_general_dilated(
        x.astype(jnp.bfloat16), w_conv.astype(jnp.bfloat16),
        window_strides=(1, 1), padding=((2, 2), (2, 2)), lhs_dilation=(2, 2),
        dimension_numbers=("NCHW", "OIHW", "NCHW"),
        preferred_element_type=jnp.float32)
    mu = jnp.mean(y_ref, axis=(0, 2, 3), keepdims=True)
    vr = jnp.mean((y_ref - mu) ** 2, axis=(0, 2, 3), keepdims=True)
    y_n = (y_ref - mu) * jax.lax.rsqrt(vr + 1e-5)
    y_n = y_n * gamma[None, :, None, None] + beta[None, :, None, None]
    y_n = jnp.maximum(y_n, 0.1 * y_n)
    ref = jnp.concatenate([y_n, skip], axis=1)

    assert out.shape == (B, Cout + Cskip, 2 * H, 2 * W)
    assert bool(jnp.all(jnp.isfinite(out)))
    assert bool(jnp.allclose(out, ref, atol=3e-2, rtol=3e-2))
    print("KERNEL_OK")
</pallas_src>

<mosaic_0001>
module attributes {stable_mosaic.version = 11 : i64} {
  func.func @_deconv_gemm_kernel(%arg0: i32, %arg1: memref<64x144xbf16, #tpu.memory_space<vmem>>, %arg2: memref<144x256xbf16, #tpu.memory_space<vmem>>, %arg3: memref<64x256xbf16, #tpu.memory_space<vmem>>, %arg4: memref<1x4x16xf32, #tpu.memory_space<vmem>>, %arg5: memref<1x4x16xf32, #tpu.memory_space<vmem>>) attributes {dimension_semantics = [#tpu.dimension_semantics<parallel>], iteration_bounds = array<i64: 2>, scalar_prefetch = 0 : i64, scratch_operands = 0 : i64, tpu.core_type = #tpu.core_type<tc>, window_params = [{pipeline_mode = #tpu.pipeline_mode<synchronous>, transform_indices = @transform_0, window_bounds = array<i64: 64, 144>}, {transform_indices = @transform_1, window_bounds = array<i64: 144, 256>}, {transform_indices = @transform_2, window_bounds = array<i64: 64, 256>}, {transform_indices = @transform_3, window_bounds = array<i64: 1, 4, 16>}, {transform_indices = @transform_4, window_bounds = array<i64: 1, 4, 16>}]} {
    %c0 = arith.constant 0 : index
    %c0_0 = arith.constant 0 : index
    %0 = vector.load %arg1[%c0, %c0_0] : memref<64x144xbf16, #tpu.memory_space<vmem>>, vector<64x144xbf16>
    %c0_1 = arith.constant 0 : index
    %c0_2 = arith.constant 0 : index
    %1 = vector.load %arg2[%c0_1, %c0_2] : memref<144x256xbf16, #tpu.memory_space<vmem>>, vector<144x256xbf16>
    %cst = arith.constant dense<0.000000e+00> : vector<64x256xf32>
    %2 = tpu.matmul %0, %1, %cst {dimension_numbers = #tpu.dot_dimension_numbers<[1], [0], [0], [1], [0, 0, 1, 1], [], []>} : vector<64x144xbf16>, vector<144x256xbf16>, vector<64x256xf32> -> vector<64x256xf32>
    %3 = arith.truncf %2 : vector<64x256xf32> to vector<64x256xbf16>
    %c0_3 = arith.constant 0 : index
    %c0_4 = arith.constant 0 : index
    %4 = vector.load %arg3[%c0_3, %c0_4] : memref<64x256xbf16, #tpu.memory_space<vmem>>, vector<64x256xbf16>
    tpu.vector_store %arg3[%c0_3, %c0_4], %3 {strides = array<i32>} : memref<64x256xbf16, #tpu.memory_space<vmem>>, vector<64x256xbf16>,
    %5 = vector.shape_cast %2 : vector<64x256xf32> to vector<4x16x256xf32>
    %cst_5 = arith.constant dense<0.000000e+00> : vector<4x16xf32>
    %6 = vector.multi_reduction <add>, %5, %cst_5 [2] : vector<4x16x256xf32> to vector<4x16xf32>
    %7 = vector.shape_cast %6 : vector<4x16xf32> to vector<1x4x16xf32>
    %c0_6 = arith.constant 0 : index
    %c0_7 = arith.constant 0 : index
    %c0_8 = arith.constant 0 : index
    %8 = vector.load %arg4[%c0_6, %c0_7, %c0_8] : memref<1x4x16xf32, #tpu.memory_space<vmem>>, vector<1x4x16xf32>
    tpu.vector_store %arg4[%c0_6, %c0_7, %c0_8], %7 {strides = array<i32>} : memref<1x4x16xf32, #tpu.memory_space<vmem>>, vector<1x4x16xf32>,
    %9 = arith.mulf %5, %5 : vector<4x16x256xf32>
    %cst_9 = arith.constant dense<0.000000e+00> : vector<4x16xf32>
    %10 = vector.multi_reduction <add>, %9, %cst_9 [2] : vector<4x16x256xf32> to vector<4x16xf32>
    %11 = vector.shape_cast %10 : vector<4x16xf32> to vector<1x4x16xf32>
    %c0_10 = arith.constant 0 : index
    %c0_11 = arith.constant 0 : index
    %c0_12 = arith.constant 0 : index
    %12 = vector.load %arg5[%c0_10, %c0_11, %c0_12] : memref<1x4x16xf32, #tpu.memory_space<vmem>>, vector<1x4x16xf32>
    tpu.vector_store %arg5[%c0_10, %c0_11, %c0_12], %11 {strides = array<i32>} : memref<1x4x16xf32, #tpu.memory_space<vmem>>, vector<1x4x16xf32>,
    return
  }
  func.func @transform_0(%arg0: i32) -> (i32, i32) {
    %c0_i32 = arith.constant 0 : i32
    %c0_i32_0 = arith.constant 0 : i32
    %c0_i32_1 = arith.constant 0 : i32
    return %c0_i32, %c0_i32_0 : i32, i32
  }
  func.func @transform_1(%arg0: i32) -> (i32, i32) {
    %c0_i32 = arith.constant 0 : i32
    %c0_i32_0 = arith.constant 0 : i32
    return %c0_i32, %arg0 : i32, i32
  }
  func.func @transform_2(%arg0: i32) -> (i32, i32) {
    %c0_i32 = arith.constant 0 : i32
    %c0_i32_0 = arith.constant 0 : i32
    return %c0_i32, %arg0 : i32, i32
  }
  func.func @transform_3(%arg0: i32) -> (i32, i32, i32) {
    %c0_i32 = arith.constant 0 : i32
    %c0_i32_0 = arith.constant 0 : i32
    %c0_i32_1 = arith.constant 0 : i32
    return %arg0, %c0_i32, %c0_i32_0 : i32, i32, i32
  }
  func.func @transform_4(%arg0: i32) -> (i32, i32, i32) {
    %c0_i32 = arith.constant 0 : i32
    %c0_i32_0 = arith.constant 0 : i32
    %c0_i32_1 = arith.constant 0 : i32
    return %arg0, %c0_i32, %c0_i32_0 : i32, i32, i32
  }
}

module attributes {stable_mosaic.version = 11 : i64} {
  func.func @_bn_lrelu_kernel(%arg0: i32, %arg1: memref<64x256xbf16, #tpu.memory_space<vmem>>, %arg2: memref<64x1xf32, #tpu.memory_space<vmem>>, %arg3: memref<64x1xf32, #tpu.memory_space<vmem>>, %arg4: memref<64x256xbf16, #tpu.memory_space<vmem>>) attributes {dimension_semantics = [#tpu.dimension_semantics<parallel>], iteration_bounds = array<i64: 2>, scalar_prefetch = 0 : i64, scratch_operands = 0 : i64, tpu.core_type = #tpu.core_type<tc>, window_params = [{transform_indices = @transform_0, window_bounds = array<i64: 64, 256>}, {pipeline_mode = #tpu.pipeline_mode<synchronous>, transform_indices = @transform_1, window_bounds = array<i64: 64, 1>}, {pipeline_mode = #tpu.pipeline_mode<synchronous>, transform_indices = @transform_2, window_bounds = array<i64: 64, 1>}, {transform_indices = @transform_3, window_bounds = array<i64: 64, 256>}]} {
    %c0 = arith.constant 0 : index
    %c0_0 = arith.constant 0 : index
    %0 = vector.load %arg1[%c0, %c0_0] : memref<64x256xbf16, #tpu.memory_space<vmem>>, vector<64x256xbf16>
    %1 = arith.extf %0 : vector<64x256xbf16> to vector<64x256xf32>
    %c0_1 = arith.constant 0 : index
    %c0_2 = arith.constant 0 : index
    %2 = vector.load %arg2[%c0_1, %c0_2] : memref<64x1xf32, #tpu.memory_space<vmem>>, vector<64x1xf32>
    %3 = vector.broadcast %2 : vector<64x1xf32> to vector<64x256xf32>
    %4 = arith.mulf %1, %3 : vector<64x256xf32>
    %c0_3 = arith.constant 0 : index
    %c0_4 = arith.constant 0 : index
    %5 = vector.load %arg3[%c0_3, %c0_4] : memref<64x1xf32, #tpu.memory_space<vmem>>, vector<64x1xf32>
    %6 = vector.broadcast %5 : vector<64x1xf32> to vector<64x256xf32>
    %7 = arith.addf %4, %6 : vector<64x256xf32>
    %cst = arith.constant 1.000000e-01 : f32
    %8 = vector.broadcast %cst : f32 to vector<64x256xf32>
    %9 = arith.mulf %8, %7 : vector<64x256xf32>
    %10 = arith.maximumf %7, %9 : vector<64x256xf32>
    %11 = arith.truncf %10 : vector<64x256xf32> to vector<64x256xbf16>
    %c0_5 = arith.constant 0 : index
    %c0_6 = arith.constant 0 : index
    %12 = vector.load %arg4[%c0_5, %c0_6] : memref<64x256xbf16, #tpu.memory_space<vmem>>, vector<64x256xbf16>
    tpu.vector_store %arg4[%c0_5, %c0_6], %11 {strides = array<i32>} : memref<64x256xbf16, #tpu.memory_space<vmem>>, vector<64x256xbf16>,
    return
  }
  func.func @transform_0(%arg0: i32) -> (i32, i32) {
    %c0_i32 = arith.constant 0 : i32
    %c0_i32_0 = arith.constant 0 : i32
    return %c0_i32, %arg0 : i32, i32
  }
  func.func @transform_1(%arg0: i32) -> (i32, i32) {
    %c0_i32 = arith.constant 0 : i32
    %c0_i32_0 = arith.constant 0 : i32
    %c0_i32_1 = arith.constant 0 : i32
    return %c0_i32, %c0_i32_0 : i32, i32
  }
  func.func @transform_2(%arg0: i32) -> (i32, i32) {
    %c0_i32 = arith.constant 0 : i32
    %c0_i32_0 = arith.constant 0 : i32
    %c0_i32_1 = arith.constant 0 : i32
    return %c0_i32, %c0_i32_0 : i32, i32
  }
  func.func @transform_3(%arg0: i32) -> (i32, i32) {
    %c0_i32 = arith.constant 0 : i32
    %c0_i32_0 = arith.constant 0 : i32
    return %c0_i32, %arg0 : i32, i32
  }
}

</mosaic_0001>

<bundles_post_ra>
// kernel: tile.18
= control target key start
LH: loop header
LB: loop body
LE: loop exit
PB: predicated region body
PF: predicated region fallthrough
CT: control target
= control target key end

     0   :  { %s22_s0 = inlined_call_operand.vmem [shape: f32[16], index: 0, kind: input, shape index: {}]   ;;  %s23_s1 = inlined_call_operand.vmem [shape: f32[4,16], index: 1, kind: output, shape index: {}]  }
   0x1   :  { %v4_v0 = vld [vmem:[%s22_s0] ss:$0 sm:$0xff] }
   0x2   :  { %5 = vst [vmem:[%s23_s1] sm:$0xf] %v4_v0 }

// kernel: tile.0
= control target key start
LH: loop header
LB: loop body
LE: loop exit
PB: predicated region body
PF: predicated region fallthrough
CT: control target
= control target key end

     0   :  { %s176_s8 = smov 125   ;;  %s177_s9 = smov 126   ;;  %vm7_vm0 = vcmask 7168   ;;  %s331_s0 = inlined_call_operand.vmem [shape: f32[4,16], index: 0, kind: input, shape index: {}]   ;;  %s332_s1 = inlined_call_operand.vmem [shape: f32[64,1], index: 1, kind: output, shape index: {}]  }
   0x1   :  { %v4_v0 = vld [vmem:[%s331_s0] sm:$0xf]  ;;  %s175_s0 = smov 127   ;;  %s178_s10 = smov 124  }
   0x2   :  { %5 = vst [vmem:[#allocation0] sm:$0xf] %v4_v0  ;;  %s179_s11 = smov 123   ;;  %s180_s12 = smov 122  }
   0x3   :  { %s181_s13 = smov 121   ;;  %s182_s14 = smov 120  }
   0x4   :  { %s183_s19 = smov 119   ;;  %s184_s20 = smov 118  }
   0x5   :  { %s185_s21 = smov 117   ;;  %s186_s22 = smov 116  }
   0x6   :  { %s187_s23 = smov 115   ;;  %s188_s24 = smov 114  }
   0x7   :  { %s189_s25 = smov 113  }
   0x9   :  { %v10_v1 = vld [vmem:[#allocation0] sm:$0xf]  }
   0xa   :  { %v26_v2 = vld [vmem:[#allocation0] sm:$0xf]   ;;  %11 = vrot.lane.b32.xlu0 %v10_v1, %s175_s0 }
   0xb   :  { %27 = vrot.lane.b32.xlu1 %v26_v2, %s176_s8  ;;  %v18_v3 = vld [vmem:[#allocation0] sm:$0xf]  }
   0xc   :  { %v34_v4 = vld [vmem:[#allocation0] sm:$0xf]  }
   0xd   :  { %v42_v5 = vld [vmem:[#allocation0] sm:$0xf]  }
   0xe   :  { %19 = vrot.lane.b32.xlu0 %v18_v3, %s177_s9  ;;  %v50_v6 = vld [vmem:[#allocation0] sm:$0xf]  }
   0xf   :  { %35 = vrot.lane.b32.xlu1 %v34_v4, %s178_s10  ;;  %v58_v7 = vld [vmem:[#allocation0] sm:$0xf]  }
  0x10   :  { %v66_v8 = vld [vmem:[#allocation0] sm:$0xf]  }
  0x11   :  { %v74_v9 = vld [vmem:[#allocation0] sm:$0xf]  }
  0x12   :  { %43 = vrot.lane.b32.xlu0 %v42_v5, %s179_s11  ;;  %v82_v10 = vld [vmem:[#allocation0] sm:$0xf]  }
  0x13   :  { %51 = vrot.lane.b32.xlu1 %v50_v6, %s180_s12  ;;  %v6_v11 = vld [vmem:[#allocation0] sm:$0xf]  }
  0x14   :  { %8 = vst.msk [vmem:[%s332_s1] ss:$16 sm:$0x3] %vm7_vm0, %v6_v11   ;;  %9 = vst.msk [vmem:[%s332_s1] ss:$16 sm:$0xc] %vm7_vm0, %v6_v11  }
  0x15   :  { %v90_v12 = vld [vmem:[#allocation0] sm:$0xf]  }
  0x16   :  { %59 = vrot.lane.b32.xlu0 %v58_v7, %s181_s13  ;;  %v98_v13 = vld [vmem:[#allocation0] sm:$0xf]  }
  0x17   :  { %67 = vrot.lane.b32.xlu1 %v66_v8, %s182_s14  ;;  %v106_v14 = vld [vmem:[#allocation0] sm:$0xf]  }
  0x18   :  { %v114_v15 = vld [vmem:[#allocation0] sm:$0xf]  }
  0x19   :  { %v122_v16 = vld [vmem:[#allocation0] sm:$0xf]  }
  0x1a   :  { %75 = vrot.lane.b32.xlu0 %v74_v9, %s183_s19 }
  0x1b   :  { %83 = vrot.lane.b32.xlu1 %v82_v10, %s184_s20 }
  0x1e   :  { %91 = vrot.lane.b32.xlu0 %v90_v12, %s185_s21 }
  0x1f   :  { %99 = vrot.lane.b32.xlu1 %v98_v13, %s186_s22 }
  0x22   :  { %107 = vrot.lane.b32.xlu0 %v106_v14, %s187_s23 }
  0x23   :  { %115 = vrot.lane.b32.xlu1 %v114_v15, %s188_s24 }
  0x26   :  { %123 = vrot.lane.b32.xlu0 %v122_v16, %s189_s25 }
  0x7c   :  { %v12_v17 = vpop.permute.xlu0 %11  }
  0x7d   :  { %v28_v18 = vpop.permute.xlu1 %27   ;;  %130 = vst.msk [vmem:[%s332_s1 + $0x1] ss:$16 sm:$0x3] %vm7_vm0, %v12_v17   ;;  %131 = vst.msk [vmem:[%s332_s1 + $0x1] ss:$16 sm:$0xc] %vm7_vm0, %v12_v17  }
  0x7e   :  { %134 = vst.msk [vmem:[%s332_s1 + $0x3] ss:$16 sm:$0x3] %vm7_vm0, %v28_v18   ;;  %135 = vst.msk [vmem:[%s332_s1 + $0x3] ss:$16 sm:$0xc] %vm7_vm0, %v28_v18  }
  0x80   :  { %v20_v19 = vpop.permute.xlu0 %19  }
  0x81   :  { %v36_v20 = vpop.permute.xlu1 %35   ;;  %132 = vst.msk [vmem:[%s332_s1 + $0x2] ss:$16 sm:$0x3] %vm7_vm0, %v20_v19   ;;  %133 = vst.msk [vmem:[%s332_s1 + $0x2] ss:$16 sm:$0xc] %vm7_vm0, %v20_v19  }
  0x82   :  { %136 = vst.msk [vmem:[%s332_s1 + $0x4] ss:$16 sm:$0x3] %vm7_vm0, %v36_v20   ;;  %137 = vst.msk [vmem:[%s332_s1 + $0x4] ss:$16 sm:$0xc] %vm7_vm0, %v36_v20  }
  0x84   :  { %v44_v21 = vpop.permute.xlu0 %43  }
  0x85   :  { %v52_v22 = vpop.permute.xlu1 %51   ;;  %138 = vst.msk [vmem:[%s332_s1 + $0x5] ss:$16 sm:$0x3] %vm7_vm0, %v44_v21   ;;  %139 = vst.msk [vmem:[%s332_s1 + $0x5] ss:$16 sm:$0xc] %vm7_vm0, %v44_v21  }
  0x86   :  { %140 = vst.msk [vmem:[%s332_s1 + $0x6] ss:$16 sm:$0x3] %vm7_vm0, %v52_v22   ;;  %141 = vst.msk [vmem:[%s332_s1 + $0x6] ss:$16 sm:$0xc] %vm7_vm0, %v52_v22  }
  0x88   :  { %v60_v23 = vpop.permute.xlu0 %59  }
  0x89   :  { %v68_v24 = vpop.permute.xlu1 %67   ;;  %142 = vst.msk [vmem:[%s332_s1 + $0x7] ss:$16 sm:$0x3] %vm7_vm0, %v60_v23   ;;  %143 = vst.msk [vmem:[%s332_s1 + $0x7] ss:$16 sm:$0xc] %vm7_vm0, %v60_v23  }
  0x8a   :  { %144 = vst.msk [vmem:[%s332_s1 + $0x8] ss:$16 sm:$0x3] %vm7_vm0, %v68_v24   ;;  %145 = vst.msk [vmem:[%s332_s1 + $0x8] ss:$16 sm:$0xc] %vm7_vm0, %v68_v24  }
  0x8c   :  { %v76_v25 = vpop.permute.xlu0 %75  }
  0x8d   :  { %v84_v26 = vpop.permute.xlu1 %83   ;;  %146 = vst.msk [vmem:[%s332_s1 + $0x9] ss:$16 sm:$0x3] %vm7_vm0, %v76_v25   ;;  %147 = vst.msk [vmem:[%s332_s1 + $0x9] ss:$16 sm:$0xc] %vm7_vm0, %v76_v25  }
  0x8e   :  { %148 = vst.msk [vmem:[%s332_s1 + $0xa] ss:$16 sm:$0x3] %vm7_vm0, %v84_v26   ;;  %149 = vst.msk [vmem:[%s332_s1 + $0xa] ss:$16 sm:$0xc] %vm7_vm0, %v84_v26  }
  0x90   :  { %v92_v27 = vpop.permute.xlu0 %91  }
  0x91   :  { %v100_v28 = vpop.permute.xlu1 %99   ;;  %150 = vst.msk [vmem:[%s332_s1 + $0xb] ss:$16 sm:$0x3] %vm7_vm0, %v92_v27   ;;  %151 = vst.msk [vmem:[%s332_s1 + $0xb] ss:$16 sm:$0xc] %vm7_vm0, %v92_v27  }
  0x92   :  { %152 = vst.msk [vmem:[%s332_s1 + $0xc] ss:$16 sm:$0x3] %vm7_vm0, %v100_v28   ;;  %153 = vst.msk [vmem:[%s332_s1 + $0xc] ss:$16 sm:$0xc] %vm7_vm0, %v100_v28  }
  0x94   :  { %v108_v29 = vpop.permute.xlu0 %107  }
  0x95   :  { %v116_v30 = vpop.permute.xlu1 %115   ;;  %154 = vst.msk [vmem:[%s332_s1 + $0xd] ss:$16 sm:$0x3] %vm7_vm0, %v108_v29   ;;  %155 = vst.msk [vmem:[%s332_s1 + $0xd] ss:$16 sm:$0xc] %vm7_vm0, %v108_v29  }
  0x96   :  { %156 = vst.msk [vmem:[%s332_s1 + $0xe] ss:$16 sm:$0x3] %vm7_vm0, %v116_v30   ;;  %157 = vst.msk [vmem:[%s332_s1 + $0xe] ss:$16 sm:$0xc] %vm7_vm0, %v116_v30  }
  0x98   :  { %v124_v31 = vpop.permute.xlu0 %123  }
  0x99   :  { %158 = vst.msk [vmem:[%s332_s1 + $0xf] ss:$16 sm:$0x3] %vm7_vm0, %v124_v31   ;;  %159 = vst.msk [vmem:[%s332_s1 + $0xf] ss:$16 sm:$0xc] %vm7_vm0, %v124_v31  }

// kernel: deconv4x4_forward.2
= control target key start
LH: loop header
LB: loop body
LE: loop exit
PB: predicated region body
PF: predicated region fallthrough
CT: control target
= control target key end

     0   :  { %s1166_s15 = smov 0   ;;  %s1168_s16 = smov 0   ;;  %s1347_s0 = inlined_call_operand.vmem [shape: bf16[64,144], index: 0, kind: input, shape index: {}]   ;;  %s1348_s1 = inlined_call_operand.vmem [shape: bf16[144,512], index: 1, kind: input, shape index: {}]   ;;  %s1349_s2 = inlined_call_operand.vmem [shape: bf16[64,512], index: 2, kind: output, shape index: {0}]   ;;  %s1350_s3 = inlined_call_operand.vmem [shape: f32[2,4,16], index: 3, kind: output, shape index: {1}]   ;;  %s1351_s4 = inlined_call_operand.vmem [shape: f32[2,4,16], index: 4, kind: output, shape index: {2}]  }
   0x1   :  { %s1170_s17 = smov 0  }
   0x2 LB: > { %s1182_s18 = sadd.s32 4294967295, %s1139_s17   ;;  %s1185_s19 = sadd.s32 1, %s1139_s17   ;;  %s1139_s17 = sphi %s1170_s17, %s1355_s17   ;;  %s1135_s16 = sphi %s1168_s16, %s1354_s16   ;;  %s1131_s15 = sphi %s1166_s15, %s1353_s15  }
   0x3   : > { %s40_s20 = ssub.s32 %s1139_s17, %s1185_s19  ;;  %s43_s21 = sadd.s32 1, %s1135_s16 }
   0x4   : > { %p41_p0 = scmp.eq.s32.totalorder %s40_s20, 0  ;;  %p50_p1 = scmp.ne.s32.totalorder %s1135_s16, %s1131_s15 }
   0x5   : > { %p51_p2 = scmp.eq.s32.totalorder %s1139_s17, 0  ;;  %p80_p3 = scmp.eq.s32.totalorder %s1182_s18, 1 }
   0x6   : > { %s1195_s22 = scalar_select %p41_p0, %s1135_s16, %s43_s21  }
   0x7   : > { %p52_p4 = por %p51_p2, %p50_p1  ;;  %p1197_p5 = por %p80_p3, %p50_p1 }
   0x8   : > { %p974_p6 = scmp.ge.s32.totalorder %s1139_s17, 2 }
   0xa   : > { %157 = sbr.rel (%p974_p6) target bundleno = 30 (0x1e), region = 20 }
  0x11   : > { %160 = sbr.rel (!%p52_p4) target bundleno = 30 (0x1e), region = 24  ;;  %s162_s24 = sand.u32 (%p52_p4), 1, %s1135_s16  }
  0x12   : > { %s1024_s25 = sshll.u32 (%p52_p4), %s1139_s17, 3  ;;  %s1052_s26 = smul.u32 (%p52_p4), 144, %s162_s24 }
  0x13   : > { %s1207_s29 = scalar_lea.vmem (%p52_p4), %s1348_s1, %s1024_s25 }
  0x14   : > { %v229_v0 = vld [vmem:[%s1207_s29] sm:$0xff] (%p52_p4)  ;;  %v231_v1 = vld [vmem:[%s1207_s29 + $0x10] sm:$0xff] (%p52_p4)  ;;  %s164_s30 = scalar_lea.vmem (%p52_p4), [#allocation2], %s1052_s26 }
  0x15   : > { %v233_v2 = vld [vmem:[%s1207_s29 + $0x20] sm:$0xff] (%p52_p4)  ;;  %v235_v3 = vld [vmem:[%s1207_s29 + $0x30] sm:$0xff] (%p52_p4)  ;;  %230 = vst [vmem:[%s164_s30] sm:$0xff] (%p52_p4), %v229_v0  ;;  %232 = vst [vmem:[%s164_s30 + $0x8] sm:$0xff] (%p52_p4), %v231_v1 }
  0x16   : > { %v237_v4 = vld [vmem:[%s1207_s29 + $0x40] sm:$0xff] (%p52_p4)  ;;  %v239_v5 = vld [vmem:[%s1207_s29 + $0x50] sm:$0xff] (%p52_p4)  ;;  %234 = vst [vmem:[%s164_s30 + $0x10] sm:$0xff] (%p52_p4), %v233_v2  ;;  %236 = vst [vmem:[%s164_s30 + $0x18] sm:$0xff] (%p52_p4), %v235_v3 }
  0x17   : > { %238 = vst [vmem:[%s164_s30 + $0x20] sm:$0xff] (%p52_p4), %v237_v4  ;;  %240 = vst [vmem:[%s164_s30 + $0x28] sm:$0xff] (%p52_p4), %v239_v5  ;;  %v241_v6 = vld [vmem:[%s1207_s29 + $0x60] sm:$0xff] (%p52_p4)  ;;  %v243_v7 = vld [vmem:[%s1207_s29 + $0x70] sm:$0xff] (%p52_p4) }
  0x18   : > { %v245_v8 = vld [vmem:[%s1207_s29 + $0x80] sm:$0xff]  ;;  %242 = vst [vmem:[%s164_s30 + $0x30] sm:$0xff] %v241_v6  ;;  %244 = vst [vmem:[%s164_s30 + $0x38] sm:$0xff] %v243_v7  ;;  %v247_v9 = vld [vmem:[%s1207_s29 + $0x90] sm:$0xff] }
  0x19   : > { %246 = vst [vmem:[%s164_s30 + $0x40] sm:$0xff] %v245_v8  ;;  %v249_v10 = vld [vmem:[%s1207_s29 + $0xa0] sm:$0xff]  ;;  %v251_v11 = vld [vmem:[%s1207_s29 + $0xb0] sm:$0xff]  ;;  %248 = vst [vmem:[%s164_s30 + $0x48] sm:$0xff] %v247_v9 }
  0x1a   : > { %250 = vst [vmem:[%s164_s30 + $0x50] sm:$0xff] %v249_v10  ;;  %252 = vst [vmem:[%s164_s30 + $0x58] sm:$0xff] %v251_v11  ;;  %v253_v12 = vld [vmem:[%s1207_s29 + $0xc0] sm:$0xff]  ;;  %v255_v13 = vld [vmem:[%s1207_s29 + $0xd0] sm:$0xff] }
  0x1b   : > { %v257_v14 = vld [vmem:[%s1207_s29 + $0xe0] sm:$0xff]  ;;  %254 = vst [vmem:[%s164_s30 + $0x60] sm:$0xff] %v253_v12  ;;  %256 = vst [vmem:[%s164_s30 + $0x68] sm:$0xff] %v255_v13  ;;  %v259_v15 = vld [vmem:[%s1207_s29 + $0xf0] sm:$0xff] }
  0x1c   : > { %258 = vst [vmem:[%s164_s30 + $0x70] sm:$0xff] %v257_v14  ;;  %v261_v16 = vld [vmem:[%s1207_s29 + $0x100] sm:$0xff]  ;;  %v263_v17 = vld [vmem:[%s1207_s29 + $0x110] sm:$0xff]  ;;  %260 = vst [vmem:[%s164_s30 + $0x78] sm:$0xff] %v259_v15 }
  0x1d   : > { %262 = vst [vmem:[%s164_s30 + $0x80] sm:$0xff] %v261_v16  ;;  %264 = vst [vmem:[%s164_s30 + $0x88] sm:$0xff] %v263_v17 }
  0x1e PF: > { %p977_p7 = scmp.ge.s32.totalorder %s1139_s17, 1  ;;  %p269_p8 = scmp.lt.s32.totalorder %s1139_s17, 3 }
  0x20   : > { %p270_p9 = pnand %p977_p7, %p269_p8 }
  0x21   : > { %s276_s5 = sand.u32 (!%p270_p9), 1, %s1131_s15   ;;  %vm471_vm0 = vcmask (!%p270_p9), 130048   ;;  %v1107_v18 = vld [vmem:[%s1347_s0 + $0x4] ss:$8 sps:$4 sm:$0xff] (!%p270_p9)   ;;  %v1105_v38 = vld [vmem:[%s1347_s0] ss:$8 sps:$4 sm:$0xff] (!%p270_p9)  }
  0x22   : > { %273 = sbr.rel (%p270_p9) target bundleno = 467 (0x1d3), region = 62  ;;  %v1110_v19 = vld [vmem:[%s1347_s0 + $0x24] ss:$8 sps:$4 sm:$0xff] (!%p270_p9)   ;;  %1007 = vmatprep.mubr.msk.bf16.mxu0 (!%p270_p9), %vm471_vm0, %v1107_v18  ;;  %v1108_v39 = vld [vmem:[%s1347_s0 + $0x20] ss:$8 sps:$4 sm:$0xff] (!%p270_p9)   ;;  %s978_s30 = sshll.u32 (!%p270_p9), %s276_s5, 6 }
  0x23   : > { %s1053_s6 = smul.u32 (!%p270_p9), 144, %s276_s5  ;;  %1009 = vmatprep.mubr.msk.bf16.mxu1 (!%p270_p9), %vm471_vm0, %v1110_v19  ;;  %v1111_v40 = vld [vmem:[%s1347_s0 + $0x14] ss:$8 sps:$4 sm:$0xff] (!%p270_p9)   ;;  %v1113_v42 = vld [vmem:[%s1347_s0 + $0x10] ss:$8 sps:$4 sm:$0xff] (!%p270_p9)   ;;  %s1282_s15 = scalar_lea.vmem (!%p270_p9), [#allocation3], %s978_s30 }
  0x24   : > { %v1114_v41 = vld [vmem:[%s1347_s0 + $0x34] ss:$8 sps:$4 sm:$0xff] (!%p270_p9)   ;;  %v1116_v43 = vld [vmem:[%s1347_s0 + $0x30] ss:$8 sps:$4 sm:$0xff] (!%p270_p9)   ;;  %p310_p10 = scmp.lt.s32.totalorder (!%p270_p9), %s1182_s18, 1  ;;  %vm685_vm1 = vcmask (!%p270_p9), 1041409  }
  0x25   : > { %s1239_s11 = scalar_lea.vmem (!%p270_p9), [#allocation2], %s1053_s6  ;;  %vm656_vm2 = vcmask (!%p270_p9), 130112   ;;  %vm687_vm3 = vcmask (!%p270_p9), 1042434   ;;  %vm689_vm4 = vcmask (!%p270_p9), 1043459   ;;  %vm692_vm5 = vcmask (!%p270_p9), 125952  }
  0x26   : > { %v1078_v20 = vld [vmem:[%s1239_s11 + $0x4] ss:$8 sps:$4 sm:$0xff] (!%p270_p9)   ;;  %v1080_v21 = vld [vmem:[%s1239_s11] ss:$8 sps:$4 sm:$0xff] (!%p270_p9)   ;;  %v1081_v22 = vld [vmem:[%s1239_s11 + $0x14] ss:$8 sps:$4 sm:$0xff] (!%p270_p9)  }
  0x27   : > { %484 = vmatprep.subr.bf16.mxu0 (!%p270_p9), %v1078_v20  ;;  %1034 = vmatprep.subr.bf16.mxu1 (!%p270_p9), %v1078_v20  ;;  %v1083_v23 = vld [vmem:[%s1239_s11 + $0x10] ss:$8 sps:$4 sm:$0xff] (!%p270_p9)   ;;  %v1084_v24 = vld [vmem:[%s1239_s11 + $0x24] ss:$8 sps:$4 sm:$0xff] (!%p270_p9)   ;;  %v1086_v25 = vld [vmem:[%s1239_s11 + $0x20] ss:$8 sps:$4 sm:$0xff] (!%p270_p9)  }
  0x28   : > { %485 = vmatpush1.bf16.msra.mxu0 (!%p270_p9), %v1080_v21  ;;  %1043 = vmatpush1.bf16.msra.mxu1 (!%p270_p9), %v1080_v21  ;;  %v1087_v26 = vld [vmem:[%s1239_s11 + $0x34] ss:$8 sps:$4 sm:$0xff] (!%p270_p9)   ;;  %v1089_v27 = vld [vmem:[%s1239_s11 + $0x30] ss:$8 sps:$4 sm:$0xff] (!%p270_p9)   ;;  %v1090_v28 = vld [vmem:[%s1239_s11 + $0x44] ss:$8 sps:$4 sm:$0xff] (!%p270_p9)  }
  0x29   : > { %486 = vmatprep.subr.bf16.mxu0 %v1081_v22  ;;  %1035 = vmatprep.subr.bf16.mxu1 %v1081_v22  ;;  %v1092_v29 = vld [vmem:[%s1239_s11 + $0x40] ss:$8 sps:$4 sm:$0xff]   ;;  %v1093_v30 = vld [vmem:[%s1239_s11 + $0x54] ss:$8 sps:$4 sm:$0xff]   ;;  %v1095_v31 = vld [vmem:[%s1239_s11 + $0x50] ss:$8 sps:$4 sm:$0xff]  }
  0x2a   : > { %v1096_v32 = vld [vmem:[%s1239_s11 + $0x64] ss:$8 sps:$4 sm:$0xff]   ;;  %v1098_v33 = vld [vmem:[%s1239_s11 + $0x60] ss:$8 sps:$4 sm:$0xff]   ;;  %v1099_v34 = vld [vmem:[%s1239_s11 + $0x74] ss:$8 sps:$4 sm:$0xff]  }
  0x2b   : > { %v1101_v35 = vld [vmem:[%s1239_s11 + $0x70] ss:$8 sps:$4 sm:$0xff]   ;;  %v1102_v36 = vld [vmem:[%s1239_s11 + $0x84] ss:$8 sps:$4 sm:$0xff]   ;;  %v1104_v37 = vld [vmem:[%s1239_s11 + $0x80] ss:$8 sps:$4 sm:$0xff]  }
  0x2c   : > { %487 = vmatpush1.bf16.msra.mxu0 %v1083_v23  ;;  %1044 = vmatpush1.bf16.msra.mxu1 %v1083_v23  ;;  %s1294_s5 = scalar_select %p310_p10, %s1182_s18, 1 }
  0x2d   : > { %488 = vmatprep.subr.bf16.mxu0 %v1084_v24  ;;  %1036 = vmatprep.subr.bf16.mxu1 %v1084_v24  ;;  %s1033_s13 = sshll.u32 (%p1197_p5), %s1182_s18, 3 }
  0x2e   : > { %s979_s6 = sshll.u32 %s1294_s5, 2  ;;  %s800_s20 = scalar_lea.vmem (%p1197_p5), %s1349_s2, %s1033_s13 }
  0x2f   : > { %s313_s9 = scalar_lea.vmem %s1350_s3, %s979_s6  ;;  %s317_s12 = scalar_lea.vmem %s1351_s4, %s979_s6 }
  0x30   : > { %489 = vmatpush1.bf16.msra.mxu0 %v1086_v25  ;;  %1045 = vmatpush1.bf16.msra.mxu1 %v1086_v25 }
  0x31   : > { %490 = vmatprep.subr.bf16.mxu0 %v1087_v26  ;;  %1037 = vmatprep.subr.bf16.mxu1 %v1087_v26 }
  0x34   : > { %491 = vmatpush1.bf16.msra.mxu0 %v1089_v27  ;;  %1046 = vmatpush1.bf16.msra.mxu1 %v1089_v27 }
  0x35   : > { %492 = vmatprep.subr.bf16.mxu0 %v1090_v28  ;;  %1038 = vmatprep.subr.bf16.mxu1 %v1090_v28 }
  0x38   : > { %493 = vmatpush1.bf16.msra.mxu0 %v1092_v29  ;;  %1047 = vmatpush1.bf16.msra.mxu1 %v1092_v29 }
  0x39   : > { %494 = vmatprep.subr.bf16.mxu0 %v1093_v30  ;;  %1039 = vmatprep.subr.bf16.mxu1 %v1093_v30 }
  0x3c   : > { %495 = vmatpush1.bf16.msra.mxu0 %v1095_v31  ;;  %1048 = vmatpush1.bf16.msra.mxu1 %v1095_v31 }
  0x3d   : > { %496 = vmatprep.subr.bf16.mxu0 %v1096_v32  ;;  %1040 = vmatprep.subr.bf16.mxu1 %v1096_v32 }
  0x40   : > { %497 = vmatpush1.bf16.msra.mxu0 %v1098_v33  ;;  %1049 = vmatpush1.bf16.msra.mxu1 %v1098_v33 }
  0x41   : > { %498 = vmatprep.subr.bf16.mxu0 %v1099_v34  ;;  %1041 = vmatprep.subr.bf16.mxu1 %v1099_v34 }
  0x44   : > { %499 = vmatpush1.bf16.msra.mxu0 %v1101_v35  ;;  %1050 = vmatpush1.bf16.msra.mxu1 %v1101_v35 }
  0x45   : > { %500 = vmatprep.subr.bf16.mxu0 %v1102_v36  ;;  %1042 = vmatprep.subr.bf16.mxu1 %v1102_v36 }
  0x48   : > { %501 = vmatpush1.bf16.msra.mxu0 %v1104_v37  ;;  %1051 = vmatpush1.bf16.msra.mxu1 %v1104_v37 }
  0x4b   : > { %517 = vmatmul.mubr.bf16.vlgmr.msra.gmra.mrb[0].mxu0 %v1105_v38  ;;  %537 = vmatmul.mubr.bf16.vlgmr.msra.gmra.mrb[0].mxu1 %v1108_v39  ;;  %v645_v38 = vlaneseq }
  0x4c   : > { %1008 = vmatprep.mubr.msk.bf16.mxu0 %vm471_vm0, %v1111_v40  ;;  %1010 = vmatprep.mubr.msk.bf16.mxu1 %vm471_vm0, %v1114_v41 }
  0x4d   : > { %v646_v41 = vand.u32 127, %v645_v38 }
  0x53   : > { %527 = vmatmul.mubr.bf16.gmra.mrb[4].mxu0 %v1113_v42  ;;  %547 = vmatmul.mubr.bf16.gmra.mrb[4].mxu1 %v1116_v43 }
 0x11e   : > { %v518_v44 = vpop.f32.mrb[0].mxu0  ;;  %v538_v45 = vpop.f32.mrb[0].mxu1 }
 0x11f   : > { %v520_v46 = vpop.f32.mrb[1].mxu0  ;;  %v540_v47 = vpop.f32.mrb[1].mxu1  ;;  %v694_v48 = vmul.f32 %v518_v44, %v518_v44  ;;  %v702_v49 = vmul.f32 %v538_v45, %v538_v45 }
 0x120   : > { %v1025_v50 = vpack.c.bf16 %v520_v46, %v518_v44  ;;  %v1029_v51 = vpack.c.bf16 %v540_v47, %v538_v45  ;;  %v522_v52 = vpop.f32.mrb[2].mxu0  ;;  %v542_v53 = vpop.f32.mrb[2].mxu1  ;;  %v613_v54 = vadd.f32 %v520_v46, %v518_v44  ;;  %v625_v55 = vadd.f32 %v540_v47, %v538_v45 }
 0x121   : > { %v524_v56 = vpop.f32.mrb[3].mxu0  ;;  %v544_v57 = vpop.f32.mrb[3].mxu1  ;;  %v696_v58 = vmul.f32 %v522_v52, %v522_v52  ;;  %v704_v59 = vmul.f32 %v542_v53, %v542_v53  ;;  %v695_v60 = vmul.f32 %v520_v46, %v520_v46  ;;  %v703_v61 = vmul.f32 %v540_v47, %v540_v47 }
 0x122   : > { %605 = vst [vmem:[%s1282_s15] sm:$0xff] %v1025_v50  ;;  %609 = vst [vmem:[%s1282_s15 + $0x20] sm:$0xff] %v1029_v51  ;;  %v1026_v62 = vpack.c.bf16 %v524_v56, %v522_v52  ;;  %v1030_v63 = vpack.c.bf16 %v544_v57, %v542_v53  ;;  %614 = vadd.xlane.f32.xlu0 %v613_v54  ;;  %v628_v0 = vadd.f32 %v544_v57, %v542_v53 }
 0x123   : > { %v697_v1 = vmul.f32 %v524_v56, %v524_v56  ;;  %v616_v2 = vadd.f32 %v524_v56, %v522_v52  ;;  %v705_v3 = vmul.f32 %v544_v57, %v544_v57  ;;  %v710_v4 = vadd.f32 %v695_v60, %v694_v48 }
 0x124   : > { %v722_v5 = vadd.f32 %v703_v61, %v702_v49  ;;  %606 = vst [vmem:[%s1282_s15 + $0x8] sm:$0xff] %v1026_v62  ;;  %610 = vst [vmem:[%s1282_s15 + $0x28] sm:$0xff] %v1030_v63  ;;  %629 = vadd.xlane.f32.xlu1 %v628_v0  ;;  %v648_v44 = vshrl.u32 %v645_v38, 7  ;;  %v651_v45 = vadd.s32 4294967288, %v646_v41 }
 0x125   : > { %v713_v6 = vadd.f32 %v697_v1, %v696_v58  ;;  %v725_v7 = vadd.f32 %v705_v3, %v704_v59 }
 0x126   : > { %626 = vadd.xlane.f32.xlu0 %v625_v55  ;;  %v528_v8 = vpop.f32.mrb[4].mxu0  ;;  %v548_v9 = vpop.f32.mrb[4].mxu1  ;;  %v649_v48 = vsub.s32 %v646_v41, %v648_v44  ;;  %v654_v49 = vsub.s32 %v651_v45, %v648_v44 }
 0x127   : > { %v530_v10 = vpop.f32.mrb[5].mxu0  ;;  %v550_v11 = vpop.f32.mrb[5].mxu1  ;;  %v698_v12 = vmul.f32 %v528_v8, %v528_v8  ;;  %v706_v13 = vmul.f32 %v548_v9, %v548_v9 }
 0x128   : > { %714 = vadd.xlane.f32.xlu1 %v713_v6  ;;  %v1027_v14 = vpack.c.bf16 %v530_v10, %v528_v8  ;;  %v532_v15 = vpop.f32.mrb[6].mxu0  ;;  %v1031_v16 = vpack.c.bf16 %v550_v11, %v548_v9  ;;  %v619_v17 = vadd.f32 %v530_v10, %v528_v8  ;;  %v552_v18 = vpop.f32.mrb[6].mxu1  ;;  %v631_v19 = vadd.f32 %v550_v11, %v548_v9 }
 0x129   : > { %v534_v20 = vpop.f32.mrb[7].mxu0  ;;  %v554_v21 = vpop.f32.mrb[7].mxu1  ;;  %v699_v22 = vmul.f32 %v530_v10, %v530_v10  ;;  %v700_v23 = vmul.f32 %v532_v15, %v532_v15  ;;  %v707_v24 = vmul.f32 %v550_v11, %v550_v11  ;;  %v708_v25 = vmul.f32 %v552_v18, %v552_v18 }
 0x12a   : > { %617 = vadd.xlane.f32.xlu0 %v616_v2  ;;  %607 = vst [vmem:[%s1282_s15 + $0x10] sm:$0xff] %v1027_v14  ;;  %v1028_v26 = vpack.c.bf16 %v534_v20, %v532_v15  ;;  %v701_v27 = vmul.f32 %v534_v20, %v534_v20  ;;  %611 = vst [vmem:[%s1282_s15 + $0x30] sm:$0xff] %v1031_v16  ;;  %v1032_v28 = vpack.c.bf16 %v554_v21, %v552_v18 }
 0x12b   : > { %v709_v29 = vmul.f32 %v554_v21, %v554_v21  ;;  %v622_v30 = vadd.f32 %v534_v20, %v532_v15  ;;  %v634_v31 = vadd.f32 %v554_v21, %v552_v18  ;;  %v716_v32 = vadd.f32 %v699_v22, %v698_v12 }
 0x12c   : > { %v728_v33 = vadd.f32 %v707_v24, %v706_v13  ;;  %726 = vadd.xlane.f32.xlu1 %v725_v7  ;;  %608 = vst [vmem:[%s1282_s15 + $0x18] sm:$0xff] %v1028_v26  ;;  %612 = vst [vmem:[%s1282_s15 + $0x38] sm:$0xff] %v1032_v28  ;;  %v719_v34 = vadd.f32 %v701_v27, %v700_v23  ;;  %v842_v24 = vld [vmem:[%s1282_s15] sm:$0xff] (%p1197_p5) }
 0x12d   : > { %v731_v35 = vadd.f32 %v709_v29, %v708_v25  ;;  %v844_v25 = vld [vmem:[%s1282_s15 + $0x8] sm:$0xff] (%p1197_p5)  ;;  %v850_v28 = vld [vmem:[%s1282_s15 + $0x20] sm:$0xff] (%p1197_p5)  ;;  %843 = vst [vmem:[%s800_s20] sm:$0xff] (%p1197_p5), %v842_v24 }
 0x12e   : > { %711 = vadd.xlane.f32.xlu0 %v710_v4  ;;  %v852_v29 = vld [vmem:[%s1282_s15 + $0x28] sm:$0xff] (%p1197_p5)  ;;  %845 = vst [vmem:[%s800_s20 + $0x10] sm:$0xff] (%p1197_p5), %v844_v25  ;;  %851 = vst [vmem:[%s800_s20 + $0x40] sm:$0xff] (%p1197_p5), %v850_v28 }
 0x12f   : > { %853 = vst [vmem:[%s800_s20 + $0x50] sm:$0xff] (%p1197_p5), %v852_v29 }
 0x130   : > { %620 = vadd.xlane.f32.xlu1 %v619_v17 }
 0x131   : > { %v846_v26 = vld [vmem:[%s1282_s15 + $0x10] sm:$0xff] (%p1197_p5) }
 0x132   : > { %723 = vadd.xlane.f32.xlu0 %v722_v5  ;;  %847 = vst [vmem:[%s800_s20 + $0x20] sm:$0xff] (%p1197_p5), %v846_v26 }
 0x133   : > { %v848_v27 = vld [vmem:[%s1282_s15 + $0x18] sm:$0xff] (%p1197_p5) }
 0x134   : > { %623 = vadd.xlane.f32.xlu1 %v622_v30  ;;  %849 = vst [vmem:[%s800_s20 + $0x30] sm:$0xff] (%p1197_p5), %v848_v27  ;;  %v854_v30 = vld [vmem:[%s1282_s15 + $0x30] sm:$0xff] (%p1197_p5) }
 0x135   : > { %855 = vst [vmem:[%s800_s20 + $0x60] sm:$0xff] (%p1197_p5), %v854_v30 }
 0x136   : > { %632 = vadd.xlane.f32.xlu0 %v631_v19 }
 0x138   : > { %635 = vadd.xlane.f32.xlu1 %v634_v31  ;;  %v856_v31 = vld [vmem:[%s1282_s15 + $0x38] sm:$0xff] (%p1197_p5) }
 0x139   : > { %857 = vst [vmem:[%s800_s20 + $0x70] sm:$0xff] (%p1197_p5), %v856_v31 }
 0x13a   : > { %717 = vadd.xlane.f32.xlu0 %v716_v32 }
 0x13c   : > { %720 = vadd.xlane.f32.xlu1 %v719_v34 }
 0x13e   : > { %729 = vadd.xlane.f32.xlu0 %v728_v33 }
 0x140   : > { %732 = vadd.xlane.f32.xlu1 %v731_v35 }
 0x1af   : > { %v615_v36 = vpop.xlane.xlu0 %614 }
 0x1b0   : > { %v650_v53 = vrot.slane %v615_v36, %v649_v48 }
 0x1b1   : > { %v630_v37 = vpop.xlane.xlu1 %629 }
 0x1b2   : > { %v674_v60 = vrot.slane %v630_v37, %v654_v49 }
 0x1b3   : > { %v627_v39 = vpop.xlane.xlu0 %626 }
 0x1b4   : > { %v670_v56 = vrot.slane %v627_v39, %v649_v48 }
 0x1b5   : > { %v715_v40 = vpop.xlane.xlu1 %714 }
 0x1b6   : > { %v675_v1 = vsel %vm656_vm2, %v674_v60, %v670_v56  ;;  %v749_v8 = vrot.slane %v715_v40, %v654_v49 }
 0x1b7   : > { %v618_v42 = vpop.xlane.xlu0 %617 }
 0x1b8   : > { %v655_v51 = vrot.slane %v618_v42, %v654_v49 }
 0x1b9   : > { %v727_v43 = vpop.xlane.xlu1 %726 }
 0x1ba   : > { %v657_v58 = vsel %vm656_vm2, %v655_v51, %v650_v53  ;;  %v767_v15 = vrot.slane %v727_v43, %v654_v49 }
 0x1bb   : > { %v712_v46 = vpop.xlane.xlu0 %711 }
 0x1bc   : > { %v745_v3 = vrot.slane %v712_v46, %v649_v48 }
 0x1bd   : > { %v621_v47 = vpop.xlane.xlu1 %620 }
 0x1be   : > { %v661_v54 = vrot.slane %v621_v47, %v649_v48  ;;  %v750_v13 = vsel %vm656_vm2, %v749_v8, %v745_v3 }
 0x1bf   : > { %v724_v50 = vpop.xlane.xlu0 %723 }
 0x1c0   : > { %v763_v11 = vrot.slane %v724_v50, %v649_v48 }
 0x1c1   : > { %v624_v52 = vpop.xlane.xlu1 %623 }
 0x1c2   : > { %v665_v55 = vrot.slane %v624_v52, %v654_v49  ;;  %v768_v20 = vsel %vm656_vm2, %v767_v15, %v763_v11 }
 0x1c3   : > { %v633_v57 = vpop.xlane.xlu0 %632 }
 0x1c4   : > { %v666_v59 = vsel %vm656_vm2, %v665_v55, %v661_v54  ;;  %v679_v63 = vrot.slane %v633_v57, %v649_v48 }
 0x1c5   : > { %v686_v61 = vsel %vm685_vm1, %v666_v59, %v657_v58  ;;  %v636_v62 = vpop.xlane.xlu1 %635 }
 0x1c6   : > { %v683_v0 = vrot.slane %v636_v62, %v654_v49  ;;  %v688_v4 = vsel %vm687_vm3, %v675_v1, %v686_v61 }
 0x1c7   : > { %v718_v2 = vpop.xlane.xlu0 %717 }
 0x1c8   : > { %v684_v5 = vsel %vm656_vm2, %v683_v0, %v679_v63  ;;  %v754_v9 = vrot.slane %v718_v2, %v649_v48 }
 0x1c9   : > { %v690_v6 = vsel %vm689_vm4, %v684_v5, %v688_v4  ;;  %v721_v7 = vpop.xlane.xlu1 %720 }
 0x1ca   : > { %693 = vst.msk [vmem:[%s313_s9] sm:$0xf] %vm692_vm5, %v690_v6  ;;  %v758_v10 = vrot.slane %v721_v7, %v654_v49 }
 0x1cb   : > { %v730_v12 = vpop.xlane.xlu0 %729 }
 0x1cc   : > { %v759_v14 = vsel %vm656_vm2, %v758_v10, %v754_v9  ;;  %v772_v18 = vrot.slane %v730_v12, %v649_v48  ;;  %797 = sbr.rel (!%p1197_p5) target bundleno = 467 (0x1d3), region = 70 }
 0x1cd   : > { %v778_v16 = vsel %vm685_vm1, %v759_v14, %v750_v13  ;;  %v733_v17 = vpop.xlane.xlu1 %732 }
 0x1ce   : > { %v776_v19 = vrot.slane %v733_v17, %v654_v49  ;;  %v779_v21 = vsel %vm687_vm3, %v768_v20, %v778_v16 }
 0x1d0   : > { %v777_v22 = vsel %vm656_vm2, %v776_v19, %v772_v18 }
 0x1d1   : > { %v780_v23 = vsel %vm689_vm4, %v777_v22, %v779_v21 }
 0x1d2   : > { %782 = vst.msk [vmem:[%s317_s12] sm:$0xf] %vm692_vm5, %v780_v23 }
 0x1d3 PF: > { %p12_p11 = scmp.ge.s32.totalorder %s1185_s19, 4   ;;  %s1353_s15 = smov %s1135_s16 }
 0x1d4   : > { %s1354_s16 = smov %s1195_s22  ;;  %s1355_s17 = smov %s1185_s19 }
 0x1d5   :  { %14 = sbr.rel (!%p12_p11) target bundleno = 2 (0x2), region = 163 }

// kernel: deconv4x4_forward.3
= control target key start
LH: loop header
LB: loop body
LE: loop exit
PB: predicated region body
PF: predicated region fallthrough
CT: control target
= control target key end

     0   :  { %s701_s12 = smov 0   ;;  %s703_s13 = smov 0   ;;  %s839_s0 = inlined_call_operand.vmem [shape: bf16[64,512], index: 0, kind: input, shape index: {}, may-alias: {0,3}]   ;;  %s840_s1 = inlined_call_operand.vmem [shape: f32[64,1], index: 1, kind: input, shape index: {}]   ;;  %s841_s2 = inlined_call_operand.vmem [shape: f32[64,1], index: 2, kind: input, shape index: {}]   ;;  %s842_s3 = inlined_call_operand.vmem [shape: bf16[64,512], index: 3, kind: output, shape index: {}, may-alias: {0,3}]  }
   0x1   :  { %s705_s14 = smov 0  }
   0x2 LB: > { %s596_s15 = sadd.s32 4294967295, %s678_s14   ;;  %s718_s16 = sadd.s32 1, %s678_s14   ;;  %s678_s14 = sphi %s705_s14, %s846_s14   ;;  %s674_s13 = sphi %s703_s13, %s845_s13   ;;  %s670_s12 = sphi %s701_s12, %s844_s12  }
   0x3   : > { %s17_s17 = ssub.s32 %s678_s14, %s718_s16  ;;  %s20_s18 = sadd.s32 1, %s674_s13 }
   0x4   : > { %p18_p0 = scmp.eq.s32.totalorder %s17_s17, 0  ;;  %p27_p1 = scmp.ne.s32.totalorder %s674_s13, %s670_s12 }
   0x5   : > { %p28_p2 = scmp.eq.s32.totalorder %s678_s14, 0  ;;  %p99_p3 = scmp.eq.s32.totalorder %s596_s15, 1 }
   0x6   : > { %s729_s19 = scalar_select %p18_p0, %s674_s13, %s20_s18  }
   0x7   : > { %p29_p4 = por %p28_p2, %p27_p1  ;;  %p731_p5 = por %p99_p3, %p27_p1 }
   0x8   : > { %p599_p6 = scmp.ge.s32.totalorder %s678_s14, 2 }
   0xa   : > { %127 = sbr.rel (%p599_p6) target bundleno = 25 (0x19), region = 24 }
  0x11   : > { %130 = sbr.rel (!%p29_p4) target bundleno = 25 (0x19), region = 28  ;;  %s132_s21 = sand.u32 (%p29_p4), 1, %s674_s13  }
  0x12   : > { %s619_s22 = sshll.u32 (%p29_p4), %s678_s14, 3  ;;  %s600_s23 = sshll.u32 (%p29_p4), %s132_s21, 6 }
  0x13   : > { %s137_s26 = scalar_lea.vmem (%p29_p4), %s839_s0, %s619_s22  ;;  %s134_s27 = scalar_lea.vmem (%p29_p4), [#allocation2], %s600_s23 }
  0x14   : > { %v179_v0 = vld [vmem:[%s137_s26] sm:$0xff] (%p29_p4)  ;;  %v181_v1 = vld [vmem:[%s137_s26 + $0x10] sm:$0xff] (%p29_p4) }
  0x15   : > { %v183_v2 = vld [vmem:[%s137_s26 + $0x20] sm:$0xff] (%p29_p4)  ;;  %180 = vst [vmem:[%s134_s27] sm:$0xff] (%p29_p4), %v179_v0  ;;  %182 = vst [vmem:[%s134_s27 + $0x8] sm:$0xff] (%p29_p4), %v181_v1  ;;  %v185_v3 = vld [vmem:[%s137_s26 + $0x30] sm:$0xff] (%p29_p4) }
  0x16   : > { %184 = vst [vmem:[%s134_s27 + $0x10] sm:$0xff] (%p29_p4), %v183_v2  ;;  %v187_v4 = vld [vmem:[%s137_s26 + $0x40] sm:$0xff] (%p29_p4)  ;;  %v189_v5 = vld [vmem:[%s137_s26 + $0x50] sm:$0xff] (%p29_p4)  ;;  %186 = vst [vmem:[%s134_s27 + $0x18] sm:$0xff] (%p29_p4), %v185_v3 }
  0x17   : > { %188 = vst [vmem:[%s134_s27 + $0x20] sm:$0xff] (%p29_p4), %v187_v4  ;;  %190 = vst [vmem:[%s134_s27 + $0x28] sm:$0xff] (%p29_p4), %v189_v5  ;;  %v191_v6 = vld [vmem:[%s137_s26 + $0x60] sm:$0xff] (%p29_p4)  ;;  %v193_v7 = vld [vmem:[%s137_s26 + $0x70] sm:$0xff] (%p29_p4) }
  0x18   : > { %192 = vst [vmem:[%s134_s27 + $0x30] sm:$0xff] %v191_v6  ;;  %194 = vst [vmem:[%s134_s27 + $0x38] sm:$0xff] %v193_v7 }
  0x19 PF: > { %p603_p7 = scmp.ge.s32.totalorder %s678_s14, 1  ;;  %p199_p8 = scmp.lt.s32.totalorder %s678_s14, 3 }
  0x1b   : > { %p200_p9 = pnand %p603_p7, %p199_p8 }
  0x1c   : > { %v256_v8 = vld [vmem:[%s840_s1 + $0x10] sm:$0xff] (!%p200_p9)  ;;  %v254_v9 = vld [vmem:[%s840_s1] sm:$0xff] (!%p200_p9)  ;;  %v680_v10 = vmov (!%p200_p9), 0   ;;  %v257_v11 = vld [vmem:[%s840_s1 + $0x18] sm:$0xff] (!%p200_p9)  ;;  %s206_s18 = sand.u32 (!%p200_p9), 1, %s670_s12  }
  0x1d   : > { %203 = sbr.rel (%p200_p9) target bundleno = 205 (0xcd), region = 66  ;;  %655 = vset.pattern.permute.xlu1 (!%p200_p9), %v680_v10  ;;  %654 = vset.pattern.permute.xlu0 (!%p200_p9), %v680_v10  ;;  %v255_v12 = vld [vmem:[%s840_s1 + $0x8] sm:$0xff] (!%p200_p9)  ;;  %v258_v14 = vld [vmem:[%s840_s1 + $0x20] sm:$0xff] (!%p200_p9)  ;;  %v261_v15 = vld [vmem:[%s840_s1 + $0x38] sm:$0xff] (!%p200_p9)  ;;  %s792_s21 = sshll.u32 (!%p200_p9), %s206_s18, 6 }
  0x1e   : > { %274 = vperm.xlu1 (!%p200_p9), %655, %v256_v8   ;;  %264 = vperm.xlu0 (!%p200_p9), %654, %v254_v9   ;;  %v259_v13 = vld [vmem:[%s840_s1 + $0x28] sm:$0xff] (!%p200_p9)  ;;  %v260_v16 = vld [vmem:[%s840_s1 + $0x30] sm:$0xff] (!%p200_p9)  ;;  %v318_v18 = vld [vmem:[%s841_s2] sm:$0xff] (!%p200_p9)  ;;  %s208_s22 = scalar_lea.vmem (!%p200_p9), [#allocation2], %s792_s21  ;;  %s802_s12 = scalar_lea.vmem (!%p200_p9), [#allocation3], %s792_s21 }
  0x1f   : > { %v319_v17 = vld [vmem:[%s841_s2 + $0x8] sm:$0xff] (!%p200_p9)  ;;  %v321_v19 = vld [vmem:[%s841_s2 + $0x18] sm:$0xff] (!%p200_p9)  ;;  %v320_v20 = vld [vmem:[%s841_s2 + $0x10] sm:$0xff] (!%p200_p9) }
  0x20   : > { %v323_v21 = vld [vmem:[%s841_s2 + $0x28] sm:$0xff] (!%p200_p9)  ;;  %v322_v22 = vld [vmem:[%s841_s2 + $0x20] sm:$0xff] (!%p200_p9)  ;;  %v325_v23 = vld [vmem:[%s841_s2 + $0x38] sm:$0xff] (!%p200_p9) }
  0x21   : > { %v324_v24 = vld [vmem:[%s841_s2 + $0x30] sm:$0xff] (!%p200_p9)  ;;  %v230_v29 = vld [vmem:[%s208_s22] sm:$0xff] (!%p200_p9)  ;;  %v231_v30 = vld [vmem:[%s208_s22 + $0x8] sm:$0xff] (!%p200_p9) }
  0x22   : > { %279 = vperm.xlu1 (!%p200_p9), %655, %v257_v11   ;;  %269 = vperm.xlu0 (!%p200_p9), %654, %v255_v12   ;;  %v232_v33 = vld [vmem:[%s208_s22 + $0x10] sm:$0xff] (!%p200_p9)  ;;  %v233_v34 = vld [vmem:[%s208_s22 + $0x18] sm:$0xff] (!%p200_p9)  ;;  %v238_v35 = vunpack.c.l.bf16 (!%p200_p9), %v230_v29  ;;  %v239_v36 = vunpack.c.h.bf16 (!%p200_p9), %v230_v29  ;;  %v240_v37 = vunpack.c.l.bf16 (!%p200_p9), %v231_v30  ;;  %v241_v38 = vunpack.c.h.bf16 (!%p200_p9), %v231_v30  ;;  %v235_v39 = vld [vmem:[%s208_s22 + $0x28] sm:$0xff] (!%p200_p9) }
  0x23   : > { %v234_v40 = vld [vmem:[%s208_s22 + $0x20] sm:$0xff] (!%p200_p9)  ;;  %v242_v43 = vunpack.c.l.bf16 (!%p200_p9), %v232_v33  ;;  %v243_v44 = vunpack.c.h.bf16 (!%p200_p9), %v232_v33  ;;  %v244_v45 = vunpack.c.l.bf16 (!%p200_p9), %v233_v34  ;;  %v245_v46 = vunpack.c.h.bf16 (!%p200_p9), %v233_v34  ;;  %v237_v47 = vld [vmem:[%s208_s22 + $0x38] sm:$0xff] (!%p200_p9)  ;;  %v797_v48 = vld [vmem:[%s208_s22 + $0x30] sm:$0xff] (!%p200_p9) }
  0x24   : > { %v248_v49 = vunpack.c.l.bf16 %v235_v39  ;;  %v249_v50 = vunpack.c.h.bf16 %v235_v39  ;;  %v246_v51 = vunpack.c.l.bf16 %v234_v40  ;;  %v247_v52 = vunpack.c.h.bf16 %v234_v40  ;;  %s628_s23 = sshll.u32 (%p731_p5), %s596_s15, 3 }
  0x25   : > { %v252_v57 = vunpack.c.l.bf16 %v237_v47  ;;  %v253_v58 = vunpack.c.h.bf16 %v237_v47  ;;  %v250_v59 = vunpack.c.l.bf16 %v797_v48  ;;  %v251_v60 = vunpack.c.h.bf16 %v797_v48  ;;  %s479_s26 = scalar_lea.vmem (%p731_p5), %s842_s3, %s628_s23 }
  0x26   : > { %289 = vperm.xlu1 %655, %v259_v13   ;;  %284 = vperm.xlu0 %654, %v258_v14  }
  0x2a   : > { %299 = vperm.xlu1 %655, %v261_v15   ;;  %294 = vperm.xlu0 %654, %v260_v16  }
  0x2e   : > { %333 = vperm.xlu1 %655, %v319_v17   ;;  %328 = vperm.xlu0 %654, %v318_v18  }
  0x32   : > { %343 = vperm.xlu1 %655, %v321_v19   ;;  %338 = vperm.xlu0 %654, %v320_v20  }
  0x36   : > { %353 = vperm.xlu1 %655, %v323_v21   ;;  %348 = vperm.xlu0 %654, %v322_v22  }
  0x3a   : > { %363 = vperm.xlu1 %655, %v325_v23   ;;  %358 = vperm.xlu0 %654, %v324_v24  }
  0x9d   : > { %v275_v25 = vpop.permute.xlu1 %274  ;;  %v265_v26 = vpop.permute.xlu0 %264 }
  0x9e   : > { %v302_v53 = vmul.f32 %v265_v26, %v238_v35  ;;  %v303_v54 = vmul.f32 %v265_v26, %v239_v36  ;;  %v306_v3 = vmul.f32 %v275_v25, %v242_v43  ;;  %v307_v4 = vmul.f32 %v275_v25, %v243_v44 }
  0xa1   : > { %v280_v27 = vpop.permute.xlu1 %279  ;;  %v270_v28 = vpop.permute.xlu0 %269 }
  0xa2   : > { %v304_v55 = vmul.f32 %v270_v28, %v240_v37  ;;  %v305_v56 = vmul.f32 %v270_v28, %v241_v38  ;;  %v308_v5 = vmul.f32 %v280_v27, %v244_v45  ;;  %v309_v6 = vmul.f32 %v280_v27, %v245_v46 }
  0xa5   : > { %v290_v31 = vpop.permute.xlu1 %289  ;;  %v285_v32 = vpop.permute.xlu0 %284 }
  0xa6   : > { %v312_v7 = vmul.f32 %v290_v31, %v248_v49  ;;  %v313_v11 = vmul.f32 %v290_v31, %v249_v50  ;;  %v310_v12 = vmul.f32 %v285_v32, %v246_v51  ;;  %v311_v13 = vmul.f32 %v285_v32, %v247_v52 }
  0xa9   : > { %v300_v41 = vpop.permute.xlu1 %299  ;;  %v795_v42 = vpop.permute.xlu0 %294 }
  0xaa   : > { %v316_v25 = vmul.f32 %v300_v41, %v252_v57  ;;  %v317_v26 = vmul.f32 %v300_v41, %v253_v58  ;;  %v314_v44 = vmul.f32 %v795_v42, %v250_v59  ;;  %v315_v48 = vmul.f32 %v795_v42, %v251_v60 }
  0xad   : > { %v334_v61 = vpop.permute.xlu1 %333  ;;  %v329_v62 = vpop.permute.xlu0 %328 }
  0xae   : > { %v368_v63 = vadd.f32 %v334_v61, %v304_v55  ;;  %v369_v0 = vadd.f32 %v334_v61, %v305_v56  ;;  %v366_v1 = vadd.f32 %v329_v62, %v302_v53  ;;  %v367_v2 = vadd.f32 %v329_v62, %v303_v54 }
  0xb0   : > { %v384_v8 = vmul.f32 0.1, %v368_v63  ;;  %v385_v9 = vmul.f32 0.1, %v369_v0  ;;  %v382_v10 = vmul.f32 0.1, %v366_v1 }
  0xb1   : > { %v383_v14 = vmul.f32 0.1, %v367_v2  ;;  %v344_v15 = vpop.permute.xlu1 %343  ;;  %v339_v16 = vpop.permute.xlu0 %338 }
  0xb2   : > { %v400_v17 = vmax.f32 %v368_v63, %v384_v8  ;;  %v401_v18 = vmax.f32 %v369_v0, %v385_v9  ;;  %v398_v19 = vmax.f32 %v366_v1, %v382_v10  ;;  %v372_v20 = vadd.f32 %v344_v15, %v308_v5 }
  0xb3   : > { %v399_v21 = vmax.f32 %v367_v2, %v383_v14  ;;  %v373_v22 = vadd.f32 %v344_v15, %v309_v6  ;;  %v370_v23 = vadd.f32 %v339_v16, %v306_v3  ;;  %v371_v24 = vadd.f32 %v339_v16, %v307_v4 }
  0xb4   : > { %v621_v27 = vpack.c.bf16 %v401_v18, %v400_v17  ;;  %v388_v28 = vmul.f32 0.1, %v372_v20 }
  0xb5   : > { %v620_v29 = vpack.c.bf16 %v399_v21, %v398_v19  ;;  %v389_v30 = vmul.f32 0.1, %v373_v22  ;;  %v386_v31 = vmul.f32 0.1, %v370_v23  ;;  %v387_v32 = vmul.f32 0.1, %v371_v24  ;;  %v354_v33 = vpop.permute.xlu1 %353  ;;  %v349_v34 = vpop.permute.xlu0 %348 }
  0xb6   : > { %463 = vst [vmem:[%s802_s12 + $0x8] sm:$0xff] %v621_v27  ;;  %v404_v35 = vmax.f32 %v372_v20, %v388_v28  ;;  %v376_v36 = vadd.f32 %v354_v33, %v312_v7  ;;  %v377_v37 = vadd.f32 %v354_v33, %v313_v11  ;;  %v374_v38 = vadd.f32 %v349_v34, %v310_v12 }
  0xb7   : > { %462 = vst [vmem:[%s802_s12] sm:$0xff] %v620_v29  ;;  %v405_v39 = vmax.f32 %v373_v22, %v389_v30  ;;  %v402_v40 = vmax.f32 %v370_v23, %v386_v31  ;;  %v403_v41 = vmax.f32 %v371_v24, %v387_v32  ;;  %v375_v43 = vadd.f32 %v349_v34, %v311_v13 }
  0xb8   : > { %v392_v45 = vmul.f32 0.1, %v376_v36  ;;  %v393_v46 = vmul.f32 0.1, %v377_v37  ;;  %v390_v47 = vmul.f32 0.1, %v374_v38 }
  0xb9   : > { %v623_v49 = vpack.c.bf16 %v405_v39, %v404_v35  ;;  %v622_v50 = vpack.c.bf16 %v403_v41, %v402_v40  ;;  %v391_v51 = vmul.f32 0.1, %v375_v43  ;;  %v364_v52 = vpop.permute.xlu1 %363  ;;  %v359_v53 = vpop.permute.xlu0 %358 }
  0xba   : > { %v408_v54 = vmax.f32 %v376_v36, %v392_v45  ;;  %v409_v55 = vmax.f32 %v377_v37, %v393_v46  ;;  %v406_v56 = vmax.f32 %v374_v38, %v390_v47  ;;  %v380_v57 = vadd.f32 %v364_v52, %v316_v25 }
  0xbb   : > { %465 = vst [vmem:[%s802_s12 + $0x18] sm:$0xff] %v623_v49  ;;  %464 = vst [vmem:[%s802_s12 + $0x10] sm:$0xff] %v622_v50  ;;  %v407_v58 = vmax.f32 %v375_v43, %v391_v51  ;;  %v381_v59 = vadd.f32 %v364_v52, %v317_v26  ;;  %v378_v61 = vadd.f32 %v359_v53, %v314_v44 }
  0xbc   : > { %v379_v62 = vadd.f32 %v359_v53, %v315_v48  ;;  %v625_v42 = vpack.c.bf16 %v409_v55, %v408_v54  ;;  %v396_v60 = vmul.f32 0.1, %v380_v57 }
  0xbd   : > { %v624_v63 = vpack.c.bf16 %v407_v58, %v406_v56  ;;  %v397_v0 = vmul.f32 0.1, %v381_v59  ;;  %v394_v1 = vmul.f32 0.1, %v378_v61  ;;  %v523_v10 = vld [vmem:[%s802_s12 + $0x8] sm:$0xff] (%p731_p5) }
  0xbe   : > { %v395_v2 = vmul.f32 0.1, %v379_v62  ;;  %467 = vst [vmem:[%s802_s12 + $0x28] sm:$0xff] %v625_v42  ;;  %v412_v3 = vmax.f32 %v380_v57, %v396_v60  ;;  %476 = sbr.rel (!%p731_p5) target bundleno = 205 (0xcd), region = 74  ;;  %v521_v9 = vld [vmem:[%s802_s12] sm:$0xff] (%p731_p5)  ;;  %524 = vst [vmem:[%s479_s26 + $0x10] sm:$0xff] (%p731_p5), %v523_v10 }
  0xbf   : > { %466 = vst [vmem:[%s802_s12 + $0x20] sm:$0xff] %v624_v63  ;;  %v413_v4 = vmax.f32 %v381_v59, %v397_v0  ;;  %v410_v5 = vmax.f32 %v378_v61, %v394_v1  ;;  %522 = vst [vmem:[%s479_s26] sm:$0xff] (%p731_p5), %v521_v9 }
  0xc0   : > { %v411_v6 = vmax.f32 %v379_v62, %v395_v2 }
  0xc1   : > { %v627_v7 = vpack.c.bf16 %v413_v4, %v412_v3 }
  0xc2   : > { %v626_v8 = vpack.c.bf16 %v411_v6, %v410_v5  ;;  %v525_v11 = vld [vmem:[%s802_s12 + $0x10] sm:$0xff] (%p731_p5)  ;;  %v527_v12 = vld [vmem:[%s802_s12 + $0x18] sm:$0xff] (%p731_p5) }
  0xc3   : > { %469 = vst [vmem:[%s802_s12 + $0x38] sm:$0xff] %v627_v7  ;;  %526 = vst [vmem:[%s479_s26 + $0x20] sm:$0xff] (%p731_p5), %v525_v11 }
  0xc4   : > { %468 = vst [vmem:[%s802_s12 + $0x30] sm:$0xff] %v626_v8  ;;  %528 = vst [vmem:[%s479_s26 + $0x30] sm:$0xff] (%p731_p5), %v527_v12 }
  0xc5   : > { %v531_v14 = vld [vmem:[%s802_s12 + $0x28] sm:$0xff] }
  0xc6   : > { %v529_v13 = vld [vmem:[%s802_s12 + $0x20] sm:$0xff]  ;;  %532 = vst [vmem:[%s479_s26 + $0x50] sm:$0xff] %v531_v14 }
  0xc7   : > { %530 = vst [vmem:[%s479_s26 + $0x40] sm:$0xff] %v529_v13 }
  0xca   : > { %v535_v16 = vld [vmem:[%s802_s12 + $0x38] sm:$0xff] }
  0xcb   : > { %v533_v15 = vld [vmem:[%s802_s12 + $0x30] sm:$0xff]  ;;  %536 = vst [vmem:[%s479_s26 + $0x70] sm:$0xff] %v535_v16 }
  0xcc   : > { %534 = vst [vmem:[%s479_s26 + $0x60] sm:$0xff] %v533_v15 }
  0xcd PF: > { %p10_p10 = scmp.ge.s32.totalorder %s718_s16, 4   ;;  %s844_s12 = smov %s674_s13 }
  0xce   : > { %s845_s13 = smov %s729_s19  ;;  %s846_s14 = smov %s718_s16 }
  0xcf   :  { %12 = sbr.rel (!%p10_p10) target bundleno = 2 (0x2), region = 143 }

</bundles_post_ra>
